<compile_context>
chip_gen: v7x
topology: tpu7x:2x2x1
jax: 0.10.0
libtpu: 0.0.40
codegen_flags: <defaults>
</compile_context>

<pallas_src>
import numpy as np
import jax
import jax.numpy as jnp
from jax.experimental import pallas as pl
from jax.experimental.pallas import tpu as pltpu

K_OUTLIERS = 16  # default k in get_unq_idx_topk
LANES = 128      # TPU lane width; out_features padded to this for unmasked stores


def _round_f32_to_f16(v):
    """Emulate torch's `.to(torch.float16)` round-trip (round-to-nearest-even) on
    non-negative, f16-normal-range f32 values using integer bit ops (no f16 vregs)."""
    bits = pltpu.bitcast(v, jnp.int32)
    lsb = (bits >> 13) & 1
    bits = bits + 0x0FFF + lsb
    bits = bits & (-8192)  # 0xFFFFE000: clear the low 13 mantissa bits
    return pltpu.bitcast(bits, jnp.float32)


def _w8sd_kernel(xg_ref,   # (k*S, I)  f32  == x[idx] flattened (gathered in wrapper)
                 xd_ref,   # (k*S, I)  f32  == x flattened
                 w2_ref,   # (2, I, NP) bf16: [0]=weight_q.T (int8 vals), [1]=weight_unq.T
                 wb_ref,   # (2, NP)   f32 : [0]=w_max (f16-rounded), [1]=bias
                 out_ref): # (k*S, NP) lane-dense output
    xg = xg_ref[...]
    xd = xd_ref[...]

    # ---- quantized path: x_q, x_max = quantize_mat(x[idx]) ----
    x_max = jnp.max(jnp.abs(xg), axis=-1, keepdims=True) / 127.0        # (k*S, 1)
    x_max = _round_f32_to_f16(x_max)                                    # .to(float16)
    inv_xmax = pl.reciprocal(x_max, approx=False)                       # EUP slot
    x_q = jnp.trunc(xg * inv_xmax)                                      # .to(int8): trunc toward 0

    # res_q = MatMulInteger(x_q, weight_q): int8-magnitude operands are exact in
    # bf16 and the f32 accumulation is exact for I=32 -> integer-exact result.
    res_q = jnp.dot(x_q.astype(jnp.bfloat16), w2_ref[0],
                    preferred_element_type=jnp.float32)                 # (k*S, NP)
    # mx = F.linear(x_max[..., None], w_max[..., None]) == fp16 outer product
    mx = _round_f32_to_f16(x_max * wb_ref[0:1, :])                      # (k*S, NP)
    res_q = res_q * mx

    # ---- unquantized path: (x * t) @ weight_unq + bias ----
    # weight_unq already has its outlier (idx) rows zeroed, so masking x with t is
    # redundant: (x * t) @ W_unq == x @ W_unq exactly for finite x.
    res_unq = jnp.dot(xd.astype(jnp.bfloat16), w2_ref[1],
                      preferred_element_type=jnp.float32)               # (k*S, NP)
    res_unq = res_unq + wb_ref[1:2, :]

    out_ref[...] = (res_q + res_unq).astype(out_ref.dtype)


def w8sd_init(origin_weight, bias, act_max, k=K_OUTLIERS):
    """Mirrors W8SDLinear.__init__ (deterministic parameter setup, plain JAX glue),
    plus one-time prepacking of the kernel operands (padding / bf16 cast / stack)."""
    out_f, in_f = origin_weight.shape
    # get_unq_idx_topk(act_max)
    col_max = jnp.abs(act_max.reshape(-1, act_max.shape[-1])).max(axis=-2)
    idx = jax.lax.top_k(col_max, k)[1].astype(jnp.int32)               # (k,)
    t = jnp.ones((in_f,), origin_weight.dtype).at[idx].set(0)
    # decomposition(W, idx, t): weight_q = W[idx] (dim-0 gather, as written), weight_unq = W * t
    weight_q_pre = origin_weight[idx]                                  # (k, in_f)
    weight_unq = (origin_weight * t).T                                 # (in_f, out_f)
    # quantize_mat(weight_q_pre)
    w_max = (jnp.max(jnp.abs(weight_q_pre), axis=-1) / 127.0).astype(jnp.float16)  # (k,)
    weight_q = jnp.trunc(
        weight_q_pre / w_max.astype(origin_weight.dtype)[:, None]).astype(jnp.int8)
    weight_q = weight_q.T                                              # (in_f, k) int8

    # ---- one-time prepack for the kernel (lane-dense, narrow dtype, stacked) ----
    NP = LANES
    wq_pad = jnp.zeros((in_f, NP), jnp.bfloat16).at[:, :k].set(
        weight_q.astype(jnp.bfloat16))                                 # int8 values, exact in bf16
    wunq_pad = jnp.zeros((in_f, NP), jnp.bfloat16).at[:, :out_f].set(
        weight_unq.astype(jnp.bfloat16))
    w2 = jnp.stack([wq_pad, wunq_pad])                                 # (2, in_f, NP)
    wb = jnp.zeros((2, NP), jnp.float32)
    wb = wb.at[0, :k].set(w_max.astype(jnp.float32))
    wb = wb.at[1, :out_f].set(bias.astype(jnp.float32))

    return {"idx": idx, "t": t, "weight_q": weight_q, "w_max": w_max,
            "weight_unq": weight_unq, "bias": bias,
            "w2": w2, "wb": wb, "out_features": out_f}


def w8sd_forward(x, params):
    B, S, I = x.shape
    idx = params["idx"]
    k = int(idx.shape[0])
    N = int(params["out_features"])
    # The module's literal `res_q + res_unq` broadcast requires batch == out_features == k.
    assert B == k and N == k, "W8SDLinear as written needs batch == out_features == k"
    KS = k * S
    NP = LANES  # out_features zero-padded to a full 128-lane slab -> unmasked stores

    # x[idx] is a tiny gather; do it (and the (k,S,I)->(k*S,I) flattening) in XLA.
    xg = x[idx].reshape(KS, I).astype(jnp.float32)
    xd = x.reshape(KS, I).astype(jnp.float32)
    w2, wb = params["w2"], params["wb"]

    cost = pl.CostEstimate(
        flops=2 * 2 * KS * I * NP + 8 * KS * NP,
        transcendentals=KS,
        bytes_accessed=(xg.nbytes + xd.nbytes + w2.nbytes + wb.nbytes
                        + KS * NP * x.dtype.itemsize),
    )

    out_pad = pl.pallas_call(
        _w8sd_kernel,
        out_shape=jax.ShapeDtypeStruct((KS, NP), x.dtype),
        grid=(1,),
        in_specs=[
            pl.BlockSpec((KS, I), lambda i: (0, 0)),       # x[idx] (flattened)
            pl.BlockSpec((KS, I), lambda i: (0, 0)),       # x      (flattened)
            pl.BlockSpec((2, I, NP), lambda i: (0, 0, 0)), # stacked weights (bf16, padded)
            pl.BlockSpec((2, NP), lambda i: (0, 0)),       # [w_max; bias]   (padded)
        ],
        out_specs=pl.BlockSpec((KS, NP), lambda i: (0, 0)),
        compiler_params=pltpu.CompilerParams(dimension_semantics=("arbitrary",)),
        cost_estimate=cost,
    )(xg, xd, w2, wb)

    # Drop the lane padding and restore (B, S, N).
    return out_pad[:, :N].reshape(B, S, N)


def w8sd_reference(x, params):
    """Plain-JAX mirror of W8SDLinear.forward (for a sanity check)."""
    idx = params["idx"]
    t = params["t"].astype(x.dtype)
    x_q_pre = x[idx]                                                   # dim-0 gather, as written
    x_unq = x * t
    x_max = (jnp.max(jnp.abs(x_q_pre), axis=-1) / 127.0).astype(jnp.float16)
    x_q = jnp.trunc(x_q_pre / x_max.astype(x.dtype)[..., None])
    res_q = jnp.matmul(x_q.astype(jnp.float32), params["weight_q"].astype(jnp.float32))
    mx = x_max[..., None] * params["w_max"][None, None, :]             # f16 * f16 -> f16
    res_q = (res_q * mx.astype(jnp.float32)).astype(x.dtype)
    res_unq = jnp.matmul(x_unq, params["weight_unq"]) + params["bias"]
    return res_q + res_unq


if __name__ == "__main__":
    key = jax.random.PRNGKey(0)
    k_w, k_b, k_x, k_a = jax.random.split(key, 4)

    B, S, I, O = 16, 8, 32, 16   # batch == out_features == k = 16 (see note at top)

    origin_weight = jax.random.normal(k_w, (O, I), dtype=jnp.float32)
    bias = jax.random.normal(k_b, (O,), dtype=jnp.float32)
    x = jax.random.normal(k_x, (B, S, I), dtype=jnp.float32)

    # act_max engineered so the top-16 columns are columns 0..15 (in scrambled order),
    # keeping the module's dim-0 gathers (x[idx], W[idx]) in range.
    perm = np.array([7, 3, 15, 0, 11, 5, 13, 2, 9, 6, 14, 1, 12, 8, 10, 4], dtype=np.float32)
    act_max = jnp.concatenate([
        jnp.asarray(100.0 + perm, dtype=jnp.float32),
        jax.random.uniform(k_a, (I - K_OUTLIERS,), dtype=jnp.float32),
    ])

    params = w8sd_init(origin_weight, bias, act_max)
    out = w8sd_forward(x, params)
    out = jax.block_until_ready(out)

    assert out.shape == (B, S, O) and out.dtype == x.dtype
    assert bool(jnp.all(jnp.isfinite(out)))
    ref = w8sd_reference(x, params)
    np.testing.assert_allclose(np.asarray(out), np.asarray(ref), rtol=1e-1, atol=1e-1)
    print("KERNEL_OK")
</pallas_src>

<mosaic_0001>
module attributes {stable_mosaic.version = 11 : i64} {
  func.func @_w8sd_kernel(%arg0: i32, %arg1: memref<128x32xf32, #tpu.memory_space<vmem>>, %arg2: memref<128x32xf32, #tpu.memory_space<vmem>>, %arg3: memref<2x32x128xbf16, #tpu.memory_space<vmem>>, %arg4: memref<2x128xf32, #tpu.memory_space<vmem>>, %arg5: memref<128x128xf32, #tpu.memory_space<vmem>>) attributes {dimension_semantics = [#tpu.dimension_semantics<arbitrary>], iteration_bounds = array<i64: 1>, scalar_prefetch = 0 : i64, scratch_operands = 0 : i64, tpu.core_type = #tpu.core_type<tc>, window_params = [{pipeline_mode = #tpu.pipeline_mode<synchronous>, transform_indices = @transform_0, window_bounds = array<i64: 128, 32>}, {pipeline_mode = #tpu.pipeline_mode<synchronous>, transform_indices = @transform_1, window_bounds = array<i64: 128, 32>}, {pipeline_mode = #tpu.pipeline_mode<synchronous>, transform_indices = @transform_2, window_bounds = array<i64: 2, 32, 128>}, {pipeline_mode = #tpu.pipeline_mode<synchronous>, transform_indices = @transform_3, window_bounds = array<i64: 2, 128>}, {pipeline_mode = #tpu.pipeline_mode<synchronous>, transform_indices = @transform_4, window_bounds = array<i64: 128, 128>}]} {
    %c0 = arith.constant 0 : index
    %c0_0 = arith.constant 0 : index
    %0 = vector.load %arg1[%c0, %c0_0] : memref<128x32xf32, #tpu.memory_space<vmem>>, vector<128x32xf32>
    %c0_1 = arith.constant 0 : index
    %c0_2 = arith.constant 0 : index
    %1 = vector.load %arg2[%c0_1, %c0_2] : memref<128x32xf32, #tpu.memory_space<vmem>>, vector<128x32xf32>
    %2 = math.absf %0 : vector<128x32xf32>
    %cst = arith.constant dense<0xFF800000> : vector<128xf32>
    %3 = vector.multi_reduction <maximumf>, %2, %cst [1] : vector<128x32xf32> to vector<128xf32>
    %4 = vector.shape_cast %3 : vector<128xf32> to vector<128x1xf32>
    %cst_3 = arith.constant 1.270000e+02 : f32
    %5 = vector.broadcast %cst_3 : f32 to vector<128x1xf32>
    %6 = arith.divf %4, %5 : vector<128x1xf32>
    %7 = tpu.bitcast %6 : vector<128x1xf32> -> vector<128x1xi32>
    %c13_i32 = arith.constant 13 : i32
    %8 = vector.broadcast %c13_i32 : i32 to vector<128x1xi32>
    %9 = arith.shrsi %7, %8 : vector<128x1xi32>
    %c1_i32 = arith.constant 1 : i32
    %10 = vector.broadcast %c1_i32 : i32 to vector<128x1xi32>
    %11 = arith.andi %9, %10 : vector<128x1xi32>
    %c4095_i32 = arith.constant 4095 : i32
    %12 = vector.broadcast %c4095_i32 : i32 to vector<128x1xi32>
    %13 = arith.addi %7, %12 : vector<128x1xi32>
    %14 = arith.addi %13, %11 : vector<128x1xi32>
    %c-8192_i32 = arith.constant -8192 : i32
    %15 = vector.broadcast %c-8192_i32 : i32 to vector<128x1xi32>
    %16 = arith.andi %14, %15 : vector<128x1xi32>
    %17 = tpu.bitcast %16 : vector<128x1xi32> -> vector<128x1xf32>
    %18 = tpu.reciprocal %17 : vector<128x1xf32> -> vector<128x1xf32>
    %19 = vector.broadcast %18 : vector<128x1xf32> to vector<128x32xf32>
    %20 = arith.mulf %0, %19 : vector<128x32xf32>
    %cst_4 = arith.constant 0.000000e+00 : f32
    %21 = vector.broadcast %cst_4 : f32 to vector<128x32xf32>
    %22 = arith.cmpf olt, %20, %21 : vector<128x32xf32>
    %23 = math.ceil %20 : vector<128x32xf32>
    %24 = math.floor %20 : vector<128x32xf32>
    %25 = arith.select %22, %23, %24 : vector<128x32xi1>, vector<128x32xf32>
    %26 = arith.truncf %25 : vector<128x32xf32> to vector<128x32xbf16>
    %c0_5 = arith.constant 0 : index
    %c0_6 = arith.constant 0 : index
    %c0_7 = arith.constant 0 : index
    %27 = vector.load %arg3[%c0_5, %c0_6, %c0_7] : memref<2x32x128xbf16, #tpu.memory_space<vmem>>, vector<1x32x128xbf16>
    %28 = vector.shape_cast %27 : vector<1x32x128xbf16> to vector<32x128xbf16>
    %cst_8 = arith.constant dense<0.000000e+00> : vector<128x128xf32>
    %29 = tpu.matmul %26, %28, %cst_8 {dimension_numbers = #tpu.dot_dimension_numbers<[1], [0], [0], [1], [0, 0, 1, 1], [], []>} : vector<128x32xbf16>, vector<32x128xbf16>, vector<128x128xf32> -> vector<128x128xf32>
    %c0_9 = arith.constant 0 : index
    %c0_10 = arith.constant 0 : index
    %30 = vector.load %arg4[%c0_9, %c0_10] : memref<2x128xf32, #tpu.memory_space<vmem>>, vector<1x128xf32>
    %31 = vector.broadcast %17 : vector<128x1xf32> to vector<128x128xf32>
    %32 = vector.broadcast %30 : vector<1x128xf32> to vector<128x128xf32>
    %33 = arith.mulf %31, %32 : vector<128x128xf32>
    %34 = tpu.bitcast %33 : vector<128x128xf32> -> vector<128x128xi32>
    %c13_i32_11 = arith.constant 13 : i32
    %35 = vector.broadcast %c13_i32_11 : i32 to vector<128x128xi32>
    %36 = arith.shrsi %34, %35 : vector<128x128xi32>
    %c1_i32_12 = arith.constant 1 : i32
    %37 = vector.broadcast %c1_i32_12 : i32 to vector<128x128xi32>
    %38 = arith.andi %36, %37 : vector<128x128xi32>
    %c4095_i32_13 = arith.constant 4095 : i32
    %39 = vector.broadcast %c4095_i32_13 : i32 to vector<128x128xi32>
    %40 = arith.addi %34, %39 : vector<128x128xi32>
    %41 = arith.addi %40, %38 : vector<128x128xi32>
    %c-8192_i32_14 = arith.constant -8192 : i32
    %42 = vector.broadcast %c-8192_i32_14 : i32 to vector<128x128xi32>
    %43 = arith.andi %41, %42 : vector<128x128xi32>
    %44 = tpu.bitcast %43 : vector<128x128xi32> -> vector<128x128xf32>
    %45 = arith.mulf %29, %44 : vector<128x128xf32>
    %46 = arith.truncf %1 : vector<128x32xf32> to vector<128x32xbf16>
    %c1 = arith.constant 1 : index
    %c0_15 = arith.constant 0 : index
    %c0_16 = arith.constant 0 : index
    %47 = vector.load %arg3[%c1, %c0_15, %c0_16] : memref<2x32x128xbf16, #tpu.memory_space<vmem>>, vector<1x32x128xbf16>
    %48 = vector.shape_cast %47 : vector<1x32x128xbf16> to vector<32x128xbf16>
    %cst_17 = arith.constant dense<0.000000e+00> : vector<128x128xf32>
    %49 = tpu.matmul %46, %48, %cst_17 {dimension_numbers = #tpu.dot_dimension_numbers<[1], [0], [0], [1], [0, 0, 1, 1], [], []>} : vector<128x32xbf16>, vector<32x128xbf16>, vector<128x128xf32> -> vector<128x128xf32>
    %c1_18 = arith.constant 1 : index
    %c0_19 = arith.constant 0 : index
    %50 = vector.load %arg4[%c1_18, %c0_19] : memref<2x128xf32, #tpu.memory_space<vmem>>, vector<1x128xf32>
    %51 = vector.broadcast %50 : vector<1x128xf32> to vector<128x128xf32>
    %52 = arith.addf %49, %51 : vector<128x128xf32>
    %53 = arith.addf %45, %52 : vector<128x128xf32>
    %c0_20 = arith.constant 0 : index
    %c0_21 = arith.constant 0 : index
    %54 = vector.load %arg5[%c0_20, %c0_21] : memref<128x128xf32, #tpu.memory_space<vmem>>, vector<128x128xf32>
    tpu.vector_store %arg5[%c0_20, %c0_21], %53 {strides = array<i32>} : memref<128x128xf32, #tpu.memory_space<vmem>>, vector<128x128xf32>,
    return
  }
  func.func @transform_0(%arg0: i32) -> (i32, i32) {
    %c0_i32 = arith.constant 0 : i32
    %c0_i32_0 = arith.constant 0 : i32
    %c0_i32_1 = arith.constant 0 : i32
    return %c0_i32, %c0_i32_0 : i32, i32
  }
  func.func @transform_1(%arg0: i32) -> (i32, i32) {
    %c0_i32 = arith.constant 0 : i32
    %c0_i32_0 = arith.constant 0 : i32
    %c0_i32_1 = arith.constant 0 : i32
    return %c0_i32, %c0_i32_0 : i32, i32
  }
  func.func @transform_2(%arg0: i32) -> (i32, i32, i32) {
    %c0_i32 = arith.constant 0 : i32
    %c0_i32_0 = arith.constant 0 : i32
    %c0_i32_1 = arith.constant 0 : i32
    %c0_i32_2 = arith.constant 0 : i32
    return %c0_i32, %c0_i32_0, %c0_i32_1 : i32, i32, i32
  }
  func.func @transform_3(%arg0: i32) -> (i32, i32) {
    %c0_i32 = arith.constant 0 : i32
    %c0_i32_0 = arith.constant 0 : i32
    %c0_i32_1 = arith.constant 0 : i32
    return %c0_i32, %c0_i32_0 : i32, i32
  }
  func.func @transform_4(%arg0: i32) -> (i32, i32) {
    %c0_i32 = arith.constant 0 : i32
    %c0_i32_0 = arith.constant 0 : i32
    %c0_i32_1 = arith.constant 0 : i32
    return %c0_i32, %c0_i32_0 : i32, i32
  }
}

</mosaic_0001>

<bundles_post_ra>
// kernel: tpu_custom_call.1
= control target key start
LH: loop header
LB: loop body
LE: loop exit
PB: predicated region body
PF: predicated region fallthrough
CT: control target
= control target key end

     0   :  { %vm67_vm0 = vcmask 261120   ;;  %s1448_s0 = inlined_call_operand.vmem [shape: f32[128,32], index: 0, kind: input, shape index: {}]   ;;  %s1449_s1 = inlined_call_operand.vmem [shape: f32[128,32], index: 1, kind: input, shape index: {}]   ;;  %s1450_s2 = inlined_call_operand.vmem [shape: bf16[2,32,128], index: 2, kind: input, shape index: {}]   ;;  %s1451_s3 = inlined_call_operand.vmem [shape: f32[2,128], index: 3, kind: input, shape index: {}]   ;;  %s1452_s4 = inlined_call_operand.hbm [shape: f32[128,128], index: 4, kind: output, shape index: {}]  }
   0x1   :  { %v1014_v0 = vld [vmem:[%s1448_s0 + $0x10] sm:$0xff]  ;;  %v1019_v1 = vld [vmem:[%s1448_s0] sm:$0xff]  ;;  %v1024_v2 = vld [vmem:[%s1448_s0 + $0x18] sm:$0xff] }
   0x2   :  { %v53_v3 = vand.u32 2147483647, %v1014_v0  ;;  %v51_v4 = vand.u32 2147483647, %v1019_v1  ;;  %v54_v5 = vand.u32 2147483647, %v1024_v2 }
   0x3   :  { %v1032_v6 = vld [vmem:[%s1448_s0 + $0x8] sm:$0xff]  ;;  %v1042_v8 = vld [vmem:[%s1448_s0 + $0x20] sm:$0xff]  ;;  %v1051_v13 = vld [vmem:[%s1448_s0 + $0x38] sm:$0xff] }
   0x4   :  { %v1037_v7 = vld [vmem:[%s1448_s0 + $0x28] sm:$0xff]  ;;  %v74_v9 = vsel %vm67_vm0, %v53_v3, -inf  ;;  %v68_v10 = vsel %vm67_vm0, %v51_v4, -inf  ;;  %v52_v11 = vand.u32 2147483647, %v1032_v6  ;;  %v77_v12 = vsel %vm67_vm0, %v54_v5, -inf }
   0x5   :  { %75 = vmax.xlane.f32.xlu1 %v74_v9  ;;  %69 = vmax.xlane.f32.xlu0 %v68_v10  ;;  %v56_v15 = vand.u32 2147483647, %v1037_v7  ;;  %v55_v16 = vand.u32 2147483647, %v1042_v8  ;;  %v1059_v17 = vld [vmem:[%s1448_s0 + $0x30] sm:$0xff]  ;;  %v1068_v22 = vld [vmem:[%s1448_s0 + $0x48] sm:$0xff] }
   0x6   :  { %v71_v14 = vsel %vm67_vm0, %v52_v11, -inf  ;;  %v58_v18 = vand.u32 2147483647, %v1051_v13  ;;  %v57_v19 = vand.u32 2147483647, %v1059_v17  ;;  %v1073_v23 = vld [vmem:[%s1448_s0 + $0x40] sm:$0xff] }
   0x7   :  { %v83_v20 = vsel %vm67_vm0, %v56_v15, -inf  ;;  %v80_v21 = vsel %vm67_vm0, %v55_v16, -inf  ;;  %v60_v26 = vand.u32 2147483647, %v1068_v22  ;;  %v59_v27 = vand.u32 2147483647, %v1073_v23 }
   0x8   :  { %v89_v24 = vsel %vm67_vm0, %v58_v18, -inf  ;;  %v86_v25 = vsel %vm67_vm0, %v57_v19, -inf  ;;  %v1082_v28 = vld [vmem:[%s1448_s0 + $0x58] sm:$0xff]  ;;  %v1087_v29 = vld [vmem:[%s1448_s0 + $0x50] sm:$0xff] }
   0x9   :  { %78 = vmax.xlane.f32.xlu1 %v77_v12  ;;  %72 = vmax.xlane.f32.xlu0 %v71_v14 }
   0xd   :  { %84 = vmax.xlane.f32.xlu1 %v83_v20  ;;  %81 = vmax.xlane.f32.xlu0 %v80_v21 }
   0xe   :  { %9 = vsyncpa [#allocation3], 0  ;;  %v95_v30 = vsel %vm67_vm0, %v60_v26, -inf  ;;  %v92_v31 = vsel %vm67_vm0, %v59_v27, -inf  ;;  %v62_v32 = vand.u32 2147483647, %v1082_v28 }
   0xf   :  { %v61_v33 = vand.u32 2147483647, %v1087_v29  ;;  %v1096_v34 = vld [vmem:[%s1448_s0 + $0x68] sm:$0xff]  ;;  %v1101_v35 = vld [vmem:[%s1448_s0 + $0x60] sm:$0xff]  ;;  %v1110_v40 = vld [vmem:[%s1448_s0 + $0x78] sm:$0xff] }
  0x10   :  { %v101_v36 = vsel %vm67_vm0, %v62_v32, -inf  ;;  %v64_v38 = vand.u32 2147483647, %v1096_v34  ;;  %v63_v39 = vand.u32 2147483647, %v1101_v35  ;;  %v1115_v41 = vld [vmem:[%s1448_s0 + $0x70] sm:$0xff] }
  0x11   :  { %90 = vmax.xlane.f32.xlu1 %v89_v24  ;;  %87 = vmax.xlane.f32.xlu0 %v86_v25  ;;  %v98_v37 = vsel %vm67_vm0, %v61_v33, -inf  ;;  %v66_v44 = vand.u32 2147483647, %v1110_v40  ;;  %v65_v45 = vand.u32 2147483647, %v1115_v41  ;;  %v923_v48 = vld [vmem:[%s1450_s2 + $0x10] sm:$0xff]  }
  0x12   :  { %v107_v42 = vsel %vm67_vm0, %v64_v38, -inf  ;;  %v104_v43 = vsel %vm67_vm0, %v63_v39, -inf  ;;  %900 = vmatprep.subr.bf16.mxu1 %v923_v48  ;;  %v924_v49 = vld [vmem:[%s1450_s2] sm:$0xff]   ;;  %v925_v50 = vld [vmem:[%s1450_s2 + $0x18] sm:$0xff]   ;;  %v36_v52 = vld [vmem:[%s1449_s1 + $0x8] sm:$0xff] }
  0x13   :  { %v113_v46 = vsel %vm67_vm0, %v66_v44, -inf  ;;  %v110_v47 = vsel %vm67_vm0, %v65_v45, -inf  ;;  %901 = vmatpush3.bf16.msra.mxu1 %v923_v48  ;;  %880 = vmatprep.subr.bf16.mxu0 %v924_v49  ;;  %v35_v51 = vld [vmem:[%s1449_s1] sm:$0xff]  ;;  %v926_v53 = vld [vmem:[%s1450_s2 + $0x8] sm:$0xff]   ;;  %v37_v55 = vld [vmem:[%s1449_s1 + $0x10] sm:$0xff] }
  0x14   :  { %881 = vmatpush3.bf16.msra.mxu0 %v924_v49  ;;  %902 = vmatprep.subr.bf16.mxu1 %v925_v50  ;;  %v635_v54 = vpack.c.bf16 %v36_v52, %v35_v51  ;;  %v38_v56 = vld [vmem:[%s1449_s1 + $0x18] sm:$0xff]  ;;  %v39_v58 = vld [vmem:[%s1449_s1 + $0x20] sm:$0xff]  ;;  %v40_v59 = vld [vmem:[%s1449_s1 + $0x28] sm:$0xff] }
  0x15   :  { %96 = vmax.xlane.f32.xlu1 %v95_v30  ;;  %93 = vmax.xlane.f32.xlu0 %v92_v31  ;;  %v636_v57 = vpack.c.bf16 %v38_v56, %v37_v55  ;;  %v41_v60 = vld [vmem:[%s1449_s1 + $0x30] sm:$0xff]  ;;  %v637_v61 = vpack.c.bf16 %v40_v59, %v39_v58  ;;  %v42_v62 = vld [vmem:[%s1449_s1 + $0x38] sm:$0xff]  ;;  %v43_v3 = vld [vmem:[%s1449_s1 + $0x40] sm:$0xff] }
  0x16   :  { %882 = vmatprep.subr.bf16.mxu0 %v926_v53  ;;  %904 = vmatprep.mubr.msk.bf16.mxu1 %vm67_vm0, %v635_v54  ;;  %v638_v63 = vpack.c.bf16 %v42_v62, %v41_v60  ;;  %v44_v4 = vld [vmem:[%s1449_s1 + $0x48] sm:$0xff]  ;;  %v45_v5 = vld [vmem:[%s1449_s1 + $0x50] sm:$0xff]  ;;  %v46_v10 = vld [vmem:[%s1449_s1 + $0x58] sm:$0xff] }
  0x17   :  { %903 = vmatpush3.bf16.msra.mxu1 %v925_v50  ;;  %v639_v9 = vpack.c.bf16 %v44_v4, %v43_v3  ;;  %v640_v11 = vpack.c.bf16 %v46_v10, %v45_v5  ;;  %v47_v12 = vld [vmem:[%s1449_s1 + $0x60] sm:$0xff]  ;;  %v48_v14 = vld [vmem:[%s1449_s1 + $0x68] sm:$0xff]  ;;  %v49_v15 = vld [vmem:[%s1449_s1 + $0x70] sm:$0xff] }
  0x18   :  { %883 = vmatpush3.bf16.msra.mxu0 %v926_v53  ;;  %v641_v16 = vpack.c.bf16 %v48_v14, %v47_v12  ;;  %v50_v18 = vld [vmem:[%s1449_s1 + $0x78] sm:$0xff] }
  0x19   :  { %102 = vmax.xlane.f32.xlu1 %v101_v36  ;;  %99 = vmax.xlane.f32.xlu0 %v98_v37  ;;  %v642_v19 = vpack.c.bf16 %v50_v18, %v49_v15 }
  0x1a   :  { %905 = vmatmul.mubr.msk.bf16.vlgmr.msra.gmra.mrb[0].mxu1 %vm67_vm0, %v636_v57 }
  0x1b   :  { %908 = vmatprep.mubr.msk.bf16.mxu1 %vm67_vm0, %v637_v61 }
  0x1d   :  { %108 = vmax.xlane.f32.xlu1 %v107_v42  ;;  %105 = vmax.xlane.f32.xlu0 %v104_v43 }
  0x21   :  { %114 = vmax.xlane.f32.xlu1 %v113_v46  ;;  %111 = vmax.xlane.f32.xlu0 %v110_v47 }
  0x22   :  { %909 = vmatmul.mubr.msk.bf16.gmra.mrb[4].mxu1 %vm67_vm0, %v638_v63 }
  0x23   :  { %912 = vmatprep.mubr.msk.bf16.mxu1 %vm67_vm0, %v639_v9 }
  0x2a   :  { %913 = vmatmul.mubr.msk.bf16.gmra.mrb[8].mxu1 %vm67_vm0, %v640_v11 }
  0x2b   :  { %916 = vmatprep.mubr.msk.bf16.mxu1 %vm67_vm0, %v641_v16 }
  0x32   :  { %917 = vmatmul.mubr.msk.bf16.gmra.mrb[12].mxu1 %vm67_vm0, %v642_v19 }
  0x92   :  { %v76_v20 = vpop.xlane.xlu1 %75  ;;  %v70_v21 = vpop.xlane.xlu0 %69 }
  0x93   :  { %v119_v24 = vmul.f32 0.007874016, %v76_v20  ;;  %v117_v25 = vmul.f32 0.007874016, %v70_v21 }
  0x95   :  { %v151_v26 = vshra.s32 %v119_v24, 13  ;;  %v183_v27 = vadd.s32 4095, %v119_v24  ;;  %v149_v30 = vshra.s32 %v117_v25, 13  ;;  %v181_v31 = vadd.s32 4095, %v117_v25 }
  0x96   :  { %v79_v32 = vpop.xlane.xlu1 %78  ;;  %v73_v33 = vpop.xlane.xlu0 %72 }
  0x97   :  { %v167_v36 = vand.u32 1, %v151_v26  ;;  %v165_v37 = vand.u32 1, %v149_v30  ;;  %v120_v38 = vmul.f32 0.007874016, %v79_v32  ;;  %v118_v39 = vmul.f32 0.007874016, %v73_v33 }
  0x99   :  { %v1191_v42 = vadd.s32 %v183_v27, %v167_v36  ;;  %v1193_v43 = vadd.s32 %v181_v31, %v165_v37  ;;  %v152_v44 = vshra.s32 %v120_v38, 13  ;;  %v184_v45 = vadd.s32 4095, %v120_v38 }
  0x9a   :  { %v150_v46 = vshra.s32 %v118_v39, 13  ;;  %v85_v47 = vpop.xlane.xlu1 %84  ;;  %v82_v48 = vpop.xlane.xlu0 %81  ;;  %v182_v54 = vadd.s32 4095, %v118_v39 }
  0x9b   :  { %v215_v49 = vand.u32 4294959104, %v1191_v42  ;;  %v213_v50 = vand.u32 4294959104, %v1193_v43  ;;  %v168_v51 = vand.u32 1, %v152_v44  ;;  %v122_v52 = vmul.f32 0.007874016, %v85_v47 }
  0x9c   :  { %v166_v53 = vand.u32 1, %v150_v46  ;;  %v121_v55 = vmul.f32 0.007874016, %v82_v48 }
  0x9d   :  { %927 = vrcp.f32 %v215_v49  ;;  %v1199_v56 = vadd.s32 %v184_v45, %v168_v51  ;;  %v154_v57 = vshra.s32 %v122_v52, 13  ;;  %v186_v58 = vadd.s32 4095, %v122_v52 }
  0x9e   :  { %929 = vrcp.f32 %v213_v50  ;;  %v1203_v59 = vadd.s32 %v182_v54, %v166_v53  ;;  %v153_v60 = vshra.s32 %v121_v55, 13  ;;  %v185_v61 = vadd.s32 4095, %v121_v55  ;;  %v91_v62 = vpop.xlane.xlu1 %90  ;;  %v88_v63 = vpop.xlane.xlu0 %87 }
  0x9f   :  { %v216_v3 = vand.u32 4294959104, %v1199_v56  ;;  %v170_v4 = vand.u32 1, %v154_v57  ;;  %v124_v5 = vmul.f32 0.007874016, %v91_v62  ;;  %v123_v9 = vmul.f32 0.007874016, %v88_v63 }
  0xa0   :  { %v214_v10 = vand.u32 4294959104, %v1203_v59  ;;  %v169_v11 = vand.u32 1, %v153_v60 }
  0xa1   :  { %931 = vrcp.f32 %v216_v3  ;;  %v1209_v12 = vadd.s32 %v186_v58, %v170_v4  ;;  %v156_v14 = vshra.s32 %v124_v5, 13  ;;  %v188_v15 = vadd.s32 4095, %v124_v5 }
  0xa2   :  { %933 = vrcp.f32 %v214_v10  ;;  %v1213_v16 = vadd.s32 %v185_v61, %v169_v11  ;;  %v155_v18 = vshra.s32 %v123_v9, 13  ;;  %v187_v19 = vadd.s32 4095, %v123_v9  ;;  %v97_v20 = vpop.xlane.xlu1 %96  ;;  %v94_v21 = vpop.xlane.xlu0 %93 }
  0xa3   :  { %v218_v24 = vand.u32 4294959104, %v1209_v12  ;;  %v172_v25 = vand.u32 1, %v156_v14  ;;  %v126_v26 = vmul.f32 0.007874016, %v97_v20  ;;  %v125_v27 = vmul.f32 0.007874016, %v94_v21 }
  0xa4   :  { %v217_v30 = vand.u32 4294959104, %v1213_v16  ;;  %v171_v31 = vand.u32 1, %v155_v18  ;;  %v1382_v12 = vld [vmem:[%s1451_s3 + $0x1] ss:$0 sm:$0xff] }
  0xa5   :  { %v1217_v32 = vadd.s32 %v188_v15, %v172_v25  ;;  %v158_v33 = vshra.s32 %v126_v26, 13  ;;  %v190_v36 = vadd.s32 4095, %v126_v26  ;;  %935 = vrcp.f32 %v218_v24 }
  0xa6   :  { %v1221_v37 = vadd.s32 %v187_v19, %v171_v31  ;;  %v157_v38 = vshra.s32 %v125_v27, 13  ;;  %v189_v39 = vadd.s32 4095, %v125_v27  ;;  %v103_v44 = vpop.xlane.xlu1 %102  ;;  %v100_v45 = vpop.xlane.xlu0 %99  ;;  %937 = vrcp.f32 %v217_v30 }
  0xa7   :  { %v928_v46 = vpop.eup %927  ;;  %v220_v47 = vand.u32 4294959104, %v1217_v32  ;;  %v174_v48 = vand.u32 1, %v158_v33  ;;  %v128_v51 = vmul.f32 0.007874016, %v103_v44  ;;  %v127_v52 = vmul.f32 0.007874016, %v100_v45 }
  0xa8   :  { %v930_v53 = vpop.eup %929  ;;  %v219_v54 = vand.u32 4294959104, %v1221_v37  ;;  %v173_v55 = vand.u32 1, %v157_v38  ;;  %v1228_v57 = vmul.f32 %v928_v46, %v1014_v0 }
  0xa9   :  { %939 = vrcp.f32 %v220_v47  ;;  %v1232_v58 = vadd.s32 %v190_v36, %v174_v48  ;;  %v160_v60 = vshra.s32 %v128_v51, 13  ;;  %v192_v61 = vadd.s32 4095, %v128_v51 }
  0xaa   :  { %941 = vrcp.f32 %v219_v54  ;;  %v1236_v62 = vadd.s32 %v189_v39, %v173_v55  ;;  %v159_v63 = vshra.s32 %v127_v52, 13  ;;  %v191_v4 = vadd.s32 4095, %v127_v52  ;;  %v109_v5 = vpop.xlane.xlu1 %108  ;;  %v106_v9 = vpop.xlane.xlu0 %105 }
  0xab   :  { %v932_v11 = vpop.eup %931  ;;  %v222_v0 = vand.u32 4294959104, %v1232_v58  ;;  %v176_v14 = vand.u32 1, %v160_v60  ;;  %v130_v15 = vmul.f32 0.007874016, %v109_v5  ;;  %v129_v18 = vmul.f32 0.007874016, %v106_v9 }
  0xac   :  { %v934_v19 = vpop.eup %933  ;;  %v221_v20 = vand.u32 4294959104, %v1236_v62  ;;  %v175_v21 = vand.u32 1, %v159_v63  ;;  %v261_v25 = vmul.f32 %v930_v53, %v1019_v1  ;;  %v1242_v26 = vmul.f32 %v932_v11, %v1024_v2 }
  0xad   :  { %943 = vrcp.f32 %v222_v0  ;;  %v1246_v27 = vadd.s32 %v192_v61, %v176_v14  ;;  %v162_v31 = vshra.s32 %v130_v15, 13  ;;  %v194_v33 = vadd.s32 4095, %v130_v15 }
  0xae   :  { %945 = vrcp.f32 %v221_v20  ;;  %v1250_v36 = vadd.s32 %v191_v4, %v175_v21  ;;  %v161_v38 = vshra.s32 %v129_v18, 13  ;;  %v193_v39 = vadd.s32 4095, %v129_v18  ;;  %v115_v44 = vpop.xlane.xlu1 %114  ;;  %v112_v45 = vpop.xlane.xlu0 %111 }
  0xaf   :  { %v224_v1 = vand.u32 4294959104, %v1246_v27  ;;  %v178_v2 = vand.u32 1, %v162_v31  ;;  %v132_v46 = vmul.f32 0.007874016, %v115_v44  ;;  %v131_v48 = vmul.f32 0.007874016, %v112_v45  ;;  %v936_v51 = vpop.eup %935 }
  0xb0   :  { %v223_v52 = vand.u32 4294959104, %v1250_v36  ;;  %v177_v53 = vand.u32 1, %v161_v38  ;;  %v262_v55 = vmul.f32 %v934_v19, %v1032_v6  ;;  %vm277_vm1 = vcmp.lt.f32.partialorder %v261_v25, 0.0  ;;  %v938_v4 = vpop.eup %937 }
  0xb1   :  { %947 = vrcp.f32 %v224_v1  ;;  %v1257_v60 = vadd.s32 %v194_v33, %v178_v2  ;;  %v164_v61 = vshra.s32 %v132_v46, 13  ;;  %v196_v63 = vadd.s32 4095, %v132_v46 }
  0xb2   :  { %949 = vrcp.f32 %v223_v52  ;;  %v1261_v5 = vadd.s32 %v193_v39, %v177_v53  ;;  %v163_v9 = vshra.s32 %v131_v48, 13  ;;  %v195_v11 = vadd.s32 4095, %v131_v48 }
  0xb3   :  { %v940_v14 = vpop.eup %939  ;;  %v1453_v15 = vand.u32 4294959104, %v1257_v60  ;;  %v180_v6 = vand.u32 1, %v164_v61  ;;  %vm278_vm2 = vcmp.lt.f32.partialorder %v262_v55, 0.0  ;;  %v293_v18 = vceil.f32 %v261_v25 }
  0xb4   :  { %v942_v19 = vpop.eup %941  ;;  %v225_v21 = vand.u32 4294959104, %v1261_v5  ;;  %v179_v31 = vand.u32 1, %v163_v9  ;;  %v294_v33 = vceil.f32 %v262_v55  ;;  %v309_v38 = vfloor.f32 %v261_v25 }
  0xb5   :  { %951 = vrcp.f32 %v1453_v15  ;;  %v1267_v44 = vadd.s32 %v196_v63, %v180_v6  ;;  %v310_v39 = vfloor.f32 %v262_v55  ;;  %vm279_vm3 = vcmp.lt.f32.partialorder %v1228_v57, 0.0 }
  0xb6   :  { %953 = vrcp.f32 %v225_v21  ;;  %v1272_v45 = vadd.s32 %v195_v11, %v179_v31  ;;  %v325_v2 = vsel %vm277_vm1, %v293_v18, %v309_v38  ;;  %vm280_vm4 = vcmp.lt.f32.partialorder %v1242_v26, 0.0 }
  0xb7   :  { %v944_v46 = vpop.eup %943  ;;  %v228_v48 = vand.u32 4294959104, %v1267_v44  ;;  %v326_v53 = vsel %vm278_vm2, %v294_v33, %v310_v39  ;;  %v295_v61 = vceil.f32 %v1228_v57  ;;  %v296_v63 = vceil.f32 %v1242_v26 }
  0xb8   :  { %v946_v9 = vpop.eup %945  ;;  %v227_v6 = vand.u32 4294959104, %v1272_v45  ;;  %v341_v15 = vpack.c.bf16 %v326_v53, %v325_v2  ;;  %v311_v11 = vfloor.f32 %v1228_v57  ;;  %v312_v25 = vfloor.f32 %v1242_v26 }
  0xb9   :  { %955 = vrcp.f32 %v228_v48  ;;  %v265_v18 = vmul.f32 %v938_v4, %v1042_v8  ;;  %v266_v55 = vmul.f32 %v936_v51, %v1037_v7  ;;  %v267_v51 = vmul.f32 %v942_v19, %v1059_v17 }
  0xba   :  { %957 = vrcp.f32 %v227_v6  ;;  %884 = vmatprep.mubr.msk.bf16.mxu0 %vm67_vm0, %v341_v15  ;;  %v327_v31 = vsel %vm279_vm3, %v295_v61, %v311_v11  ;;  %v328_v33 = vsel %vm280_vm4, %v296_v63, %v312_v25  ;;  %v268_v15 = vmul.f32 %v940_v14, %v1051_v13 }
  0xbb   :  { %v948_v38 = vpop.eup %947  ;;  %v342_v39 = vpack.c.bf16 %v328_v33, %v327_v31  ;;  %vm281_vm5 = vcmp.lt.f32.partialorder %v265_v18, 0.0  ;;  %vm282_vm6 = vcmp.lt.f32.partialorder %v266_v55, 0.0  ;;  %v297_v2 = vceil.f32 %v265_v18 }
  0xbc   :  { %v950_v53 = vpop.eup %949  ;;  %v298_v8 = vceil.f32 %v266_v55  ;;  %v313_v4 = vfloor.f32 %v265_v18  ;;  %v314_v7 = vfloor.f32 %v266_v55  ;;  %v269_v57 = vmul.f32 %v946_v9, %v1073_v23 }
  0xbd   :  { %885 = vmatmul.mubr.msk.bf16.vlgmr.msra.gmra.mrb[0].mxu0 %vm67_vm0, %v342_v39  ;;  %v270_v26 = vmul.f32 %v944_v46, %v1068_v22  ;;  %v271_v61 = vmul.f32 %v950_v53, %v1087_v29  ;;  %vm283_vm7 = vcmp.lt.f32.partialorder %v267_v51, 0.0  ;;  %v299_v25 = vceil.f32 %v267_v51 }
  0xbe   :  { %v329_v63 = vsel %vm281_vm5, %v297_v2, %v313_v4  ;;  %v330_v11 = vsel %vm282_vm6, %v298_v8, %v314_v7  ;;  %vm284_vm8 = vcmp.lt.f32.partialorder %v268_v15, 0.0  ;;  %v300_v18 = vceil.f32 %v268_v15 }
  0xbf   :  { %v952_v31 = vpop.eup %951  ;;  %v343_v33 = vpack.c.bf16 %v330_v11, %v329_v63  ;;  %v315_v55 = vfloor.f32 %v267_v51  ;;  %v316_v19 = vfloor.f32 %v268_v15  ;;  %vm285_vm9 = vcmp.lt.f32.partialorder %v269_v57, 0.0 }
  0xc0   :  { %v954_v17 = vpop.eup %953  ;;  %vm286_vm10 = vcmp.lt.f32.partialorder %v270_v26, 0.0  ;;  %v301_v13 = vceil.f32 %v269_v57  ;;  %v302_v22 = vceil.f32 %v270_v26  ;;  %v317_v14 = vfloor.f32 %v269_v57 }
  0xc1   :  { %888 = vmatprep.mubr.msk.bf16.mxu0 %vm67_vm0, %v343_v33  ;;  %v331_v23 = vsel %vm283_vm7, %v299_v25, %v315_v55  ;;  %v318_v29 = vfloor.f32 %v270_v26  ;;  %v332_v46 = vsel %vm284_vm8, %v300_v18, %v316_v19  ;;  %v272_v9 = vmul.f32 %v948_v38, %v1082_v28 }
  0xc2   :  { %vm287_vm11 = vcmp.lt.f32.partialorder %v271_v61, 0.0  ;;  %v303_v39 = vceil.f32 %v271_v61  ;;  %v344_v53 = vpack.c.bf16 %v332_v46, %v331_v23  ;;  %v333_v8 = vsel %vm285_vm9, %v301_v13, %v317_v14 }
  0xc3   :  { %v956_v2 = vpop.eup %955  ;;  %v334_v4 = vsel %vm286_vm10, %v302_v22, %v318_v29  ;;  %v319_v7 = vfloor.f32 %v271_v61  ;;  %vm288_vm12 = vcmp.lt.f32.partialorder %v272_v9, 0.0  ;;  %v304_v63 = vceil.f32 %v272_v9 }
  0xc4   :  { %v958_v51 = vpop.eup %957  ;;  %v345_v15 = vpack.c.bf16 %v334_v4, %v333_v8  ;;  %v320_v11 = vfloor.f32 %v272_v9  ;;  %v273_v57 = vmul.f32 %v954_v17, %v1101_v35  ;;  %v274_v26 = vmul.f32 %v952_v31, %v1096_v34 }
  0xc5   :  { %889 = vmatmul.mubr.msk.bf16.gmra.mrb[4].mxu0 %vm67_vm0, %v344_v53  ;;  %v275_v28 = vmul.f32 %v958_v51, %v1115_v41  ;;  %v335_v38 = vsel %vm287_vm11, %v303_v39, %v319_v7  ;;  %v276_v33 = vmul.f32 %v956_v2, %v1110_v40 }
  0xc6   :  { %892 = vmatprep.mubr.msk.bf16.mxu0 %vm67_vm0, %v345_v15  ;;  %v336_v25 = vsel %vm288_vm12, %v304_v63, %v320_v11  ;;  %vm289_vm13 = vcmp.lt.f32.partialorder %v273_v57, 0.0  ;;  %vm290_vm14 = vcmp.lt.f32.partialorder %v274_v26, 0.0  ;;  %v305_v18 = vceil.f32 %v273_v57 }
  0xc7   :  { %v306_v55 = vceil.f32 %v274_v26  ;;  %v321_v19 = vfloor.f32 %v273_v57  ;;  %v322_v13 = vfloor.f32 %v274_v26  ;;  %v346_v23 = vpack.c.bf16 %v336_v25, %v335_v38  ;;  %v1343_v25 = vld [vmem:[%s1451_s3] ss:$0 sm:$0xff]  ;;  %s983_s3 = smov [#allocation2]  }
  0xc8   :  { %v307_v22 = vceil.f32 %v275_v28  ;;  %v308_v35 = vceil.f32 %v276_v33  ;;  %v323_v31 = vfloor.f32 %v275_v28  ;;  %v324_v41 = vfloor.f32 %v276_v33  ;;  %s823_s9 = sshll.u32 %s983_s3, 4  ;;  %s824_s9 = int_to_ptr.vmem [resolvable:$true] %s823_s9 }
  0xc9   :  { %v337_v17 = vsel %vm289_vm13, %v305_v18, %v321_v19  ;;  %v338_v34 = vsel %vm290_vm14, %v306_v55, %v322_v13  ;;  %vm291_vm15 = vcmp.lt.f32.partialorder %v275_v28, 0.0  ;;  %vm292_vm1 = vcmp.lt.f32.partialorder %v276_v33, 0.0  ;;  %s959_s10 = scalar_lea.vmem %s824_s9, 2048  ;;  %p964_p1 = scmp.lt.s32.totalorder %s824_s9, %s824_s9 }
  0xca   :  { %v347_v14 = vpack.c.bf16 %v338_v34, %v337_v17  ;;  %v339_v40 = vsel %vm291_vm15, %v307_v22, %v323_v31  ;;  %v340_v61 = vsel %vm292_vm1, %v308_v35, %v324_v41  ;;  %v493_v33 = vmul.f32 %v1343_v25, %v215_v49  ;;  %p960_p0 = scmp.ne.s32.totalorder %s824_s9, %s959_s10  ;;  %p965_p2 = scmp.lt.s32.totalorder %s959_s10, %s959_s10 }
  0xcb   :  { %v348_v29 = vpack.c.bf16 %v340_v61, %v339_v40  ;;  %v491_v18 = vmul.f32 %v1343_v25, %v213_v50  ;;  %v494_v19 = vmul.f32 %v1343_v25, %v216_v3  ;;  %v497_v42 = vmul.f32 %v1343_v25, %v219_v54 }
  0xcc   :  { %v525_v55 = vshra.s32 %v493_v33, 13  ;;  %v495_v43 = vmul.f32 %v1343_v25, %v217_v30  ;;  %v498_v56 = vmul.f32 %v1343_v25, %v220_v47  ;;  %v557_v3 = vadd.s32 4095, %v493_v33  ;;  %p966_p3 = por %p965_p2, %p964_p1 }
  0xcd   :  { %893 = vmatmul.mubr.msk.bf16.gmra.mrb[8].mxu0 %vm67_vm0, %v346_v23  ;;  %v523_v13 = vshra.s32 %v491_v18, 13  ;;  %v492_v23 = vmul.f32 %v1343_v25, %v214_v10  ;;  %v526_v50 = vshra.s32 %v494_v19, 13  ;;  %v529_v59 = vshra.s32 %v497_v42, 13 }
  0xce   :  { %896 = vmatprep.mubr.msk.bf16.mxu0 %vm67_vm0, %v347_v14  ;;  %v541_v49 = vand.u32 1, %v525_v55  ;;  %v555_v17 = vadd.s32 4095, %v491_v18  ;;  %v527_v10 = vshra.s32 %v495_v43, 13  ;;  %v496_v16 = vmul.f32 %v1343_v25, %v218_v24  ;;  %p967_p4 = pnand %p966_p3, %p960_p0 }
  0xcf   :  { %v539_v22 = vand.u32 1, %v523_v13  ;;  %v524_v35 = vshra.s32 %v492_v23, 13  ;;  %v542_v37 = vand.u32 1, %v526_v50  ;;  %v530_v31 = vshra.s32 %v498_v56, 13 }
  0xd0   :  { %v573_v34 = vadd.s32 %v557_v3, %v541_v49  ;;  %v1372_v41 = vmul.f32 %v1343_v25, %v228_v48  ;;  %v558_v32 = vadd.s32 4095, %v494_v19  ;;  %v545_v47 = vand.u32 1, %v529_v59 }
  0xd1   :  { %v571_v54 = vadd.s32 %v555_v17, %v539_v22  ;;  %v540_v30 = vand.u32 1, %v524_v35  ;;  %v1377_v14 = vmul.f32 %v1343_v25, %v227_v6  ;;  %v556_v24 = vadd.s32 4095, %v492_v23 }
  0xd2   :  { %v543_v40 = vand.u32 1, %v527_v10  ;;  %v501_v44 = vmul.f32 %v1343_v25, %v223_v52  ;;  %v589_v48 = vand.u32 4294959104, %v573_v34  ;;  %v574_v61 = vadd.s32 %v558_v32, %v542_v37 }
  0xd3   :  { %v528_v33 = vshra.s32 %v496_v16, 13  ;;  %v587_v18 = vand.u32 4294959104, %v571_v54  ;;  %v572_v45 = vadd.s32 %v556_v24, %v540_v30  ;;  %v559_v55 = vadd.s32 4095, %v495_v43 }
  0xd4   :  { %v546_v6 = vand.u32 1, %v530_v31  ;;  %v562_v49 = vadd.s32 4095, %v498_v56  ;;  %v499_v23 = vmul.f32 %v1343_v25, %v221_v20  ;;  %v560_v22 = vadd.s32 4095, %v496_v16 }
  0xd5   :  { %897 = vmatmul.mubr.msk.bf16.gmra.mrb[12].mxu0 %vm67_vm0, %v348_v29  ;;  %v561_v29 = vadd.s32 4095, %v497_v42  ;;  %v575_v52 = vadd.s32 %v559_v55, %v543_v40  ;;  %v533_v35 = vshra.s32 %v501_v44, 13  ;;  %v590_v59 = vand.u32 4294959104, %v574_v61 }
  0xd6   :  { %v544_v17 = vand.u32 1, %v528_v33  ;;  %v588_v10 = vand.u32 4294959104, %v572_v45  ;;  %v578_v62 = vadd.s32 %v562_v49, %v546_v6  ;;  %v500_v20 = vmul.f32 %v1343_v25, %v222_v0 }
  0xd7   :  { %v577_v13 = vadd.s32 %v561_v29, %v545_v47  ;;  %v531_v54 = vshra.s32 %v499_v23, 13  ;;  %v549_v31 = vand.u32 1, %v533_v35  ;;  %v591_v40 = vand.u32 4294959104, %v575_v52 }
  0xd8   :  { %v576_v24 = vadd.s32 %v560_v22, %v544_v17  ;;  %v594_v29 = vand.u32 4294959104, %v578_v62  ;;  %v563_v6 = vadd.s32 4095, %v499_v23  ;;  %v564_v35 = vadd.s32 4095, %v500_v20 }
  0xd9   :  { %v593_v47 = vand.u32 4294959104, %v577_v13  ;;  %v547_v33 = vand.u32 1, %v531_v54 }
  0xda   :  { %v592_v49 = vand.u32 4294959104, %v576_v24 }
  0xed   :  { %v906_v46 = vpop.f32.mrb[0].mxu1 }
  0xee   :  { %v723_v9 = vpop.f32.mrb[1].mxu1  ;;  %v732_v19 = vadd.f32 %v906_v46, %v1382_v12  ;;  %v502_v46 = vmul.f32 %v1343_v25, %v224_v1 }
  0xef   :  { %v1312_v39 = vpop.f32.mrb[2].mxu1  ;;  %v724_v36 = vadd.f32 %v1382_v12, %v723_v9 }
  0xf0   :  { %v1314_v2 = vpop.f32.mrb[3].mxu1  ;;  %v735_v9 = vadd.f32 %v1312_v39, %v1382_v12  ;;  %v534_v58 = vshra.s32 %v502_v46, 13  ;;  %v532_v39 = vshra.s32 %v500_v20, 13 }
  0xf1   :  { %v727_v27 = vadd.f32 %v1382_v12, %v1314_v2  ;;  %v537_v2 = vshra.s32 %v1377_v14, 13 }
  0xf2   :  { %v548_v22 = vand.u32 1, %v532_v39 }
  0xf3   :  { %v553_v20 = vand.u32 1, %v537_v2 }
  0xf5   :  { %v1316_v53 = vpop.f32.mrb[4].mxu1 }
  0xf6   :  { %v1318_v8 = vpop.f32.mrb[5].mxu1  ;;  %v748_v61 = vadd.f32 %v1316_v53, %v1382_v12  ;;  %v566_v53 = vadd.s32 4095, %v502_v46 }
  0xf7   :  { %v1320_v4 = vpop.f32.mrb[6].mxu1 }
  0xf8   :  { %v1322_v7 = vpop.f32.mrb[7].mxu1  ;;  %v751_v23 = vadd.f32 %v1320_v4, %v1382_v12 }
  0xf9   :  { %v743_v17 = vadd.f32 %v1382_v12, %v1322_v7  ;;  %v569_v7 = vadd.s32 4095, %v1377_v14 }
  0xfb   :  { %v585_v24 = vadd.s32 %v569_v7, %v553_v20 }
  0xfd   :  { %v1324_v51 = vpop.f32.mrb[8].mxu1 }
  0xfe   :  { %v1326_v15 = vpop.f32.mrb[9].mxu1 }
  0xff   :  { %v1328_v63 = vpop.f32.mrb[10].mxu1 }
 0x100   :  { %v1330_v11 = vpop.f32.mrb[11].mxu1  ;;  %v767_v14 = vadd.f32 %v1328_v63, %v1382_v12 }
 0x105   :  { %v1332_v57 = vpop.f32.mrb[12].mxu1 }
 0x106   :  { %v1334_v26 = vpop.f32.mrb[13].mxu1  ;;  %v780_v63 = vadd.f32 %v1332_v57, %v1382_v12 }
 0x107   :  { %v1336_v28 = vpop.f32.mrb[14].mxu1 }
 0x108   :  { %v1338_v38 = vpop.f32.mrb[15].mxu1 }
 0x109   :  { %v775_v57 = vadd.f32 %v1382_v12, %v1338_v38 }
 0x190   :  { %v886_v50 = vpop.f32.mrb[0].mxu0 }
 0x191   :  { %v621_v42 = vmul.f32 %v886_v50, %v589_v48  ;;  %v423_v3 = vpop.f32.mrb[1].mxu0  ;;  %v565_v48 = vadd.s32 4095, %v501_v44  ;;  %v503_v44 = vmul.f32 %v1343_v25, %v225_v21  ;;  %v579_v21 = vadd.s32 %v563_v6, %v547_v33 }
 0x192   :  { %v619_v43 = vmul.f32 %v587_v18, %v423_v3  ;;  %v887_v56 = vpop.f32.mrb[2].mxu0  ;;  %v740_v18 = vadd.f32 %v1382_v12, %v1318_v8 }
 0x193   :  { %v788_v34 = vadd.f32 %v732_v19, %v621_v42  ;;  %v622_v37 = vmul.f32 %v887_v56, %v590_v59  ;;  %v426_v16 = vpop.f32.mrb[3].mxu0  ;;  %v581_v55 = vadd.s32 %v565_v48, %v549_v31  ;;  %v1454_v42 = vand.u32 4294959104, %v1257_v60 }
 0x194   :  { %v786_v30 = vadd.f32 %v724_v36, %v619_v43  ;;  %v620_v1 = vmul.f32 %v588_v10, %v426_v16  ;;  %v550_v36 = vand.u32 1, %v534_v58  ;;  %v535_v56 = vshra.s32 %v503_v44, 13 }
 0x195   :  { %804 = vst [vmem:[#allocation2 + $0x10] sm:$0xff] %v788_v34  ;;  %v789_v32 = vadd.f32 %v735_v9, %v622_v37  ;;  %v504_v8 = vmul.f32 %v1343_v25, %v1454_v42  ;;  %v538_v60 = vshra.s32 %v1372_v41, 13  ;;  %v580_v9 = vadd.s32 %v564_v35, %v548_v22 }
 0x196   :  { %802 = vst [vmem:[#allocation2] sm:$0xff] %v786_v30  ;;  %v787_v0 = vadd.f32 %v727_v27, %v620_v1  ;;  %v582_v62 = vadd.s32 %v566_v53, %v550_v36  ;;  %v764_v34 = vadd.f32 %v1324_v51, %v1382_v12  ;;  %v597_v37 = vand.u32 4294959104, %v581_v55 }
 0x197   :  { %805 = vst [vmem:[#allocation2 + $0x18] sm:$0xff] %v789_v32  ;;  %v536_v4 = vshra.s32 %v504_v8, 13  ;;  %v756_v16 = vadd.f32 %v1382_v12, %v1326_v15  ;;  %v595_v27 = vand.u32 4294959104, %v579_v21  ;;  %v551_v30 = vand.u32 1, %v535_v56 }
 0x198   :  { %803 = vst [vmem:[#allocation2 + $0x8] sm:$0xff] %v787_v0  ;;  %v890_v45 = vpop.f32.mrb[4].mxu0  ;;  %v570_v1 = vadd.s32 4095, %v1372_v41  ;;  %v554_v58 = vand.u32 1, %v538_v60  ;;  %v596_v51 = vand.u32 4294959104, %v580_v9  ;;  %v567_v48 = vadd.s32 4095, %v503_v44 }
 0x199   :  { %v625_v19 = vmul.f32 %v890_v45, %v593_v47  ;;  %v439_v13 = vpop.f32.mrb[5].mxu0  ;;  %v598_v47 = vand.u32 4294959104, %v582_v62  ;;  %v552_v39 = vand.u32 1, %v536_v4  ;;  %v568_v33 = vadd.s32 4095, %v504_v8 }
 0x19a   :  { %v623_v50 = vmul.f32 %v591_v40, %v439_v13  ;;  %v891_v52 = vpop.f32.mrb[6].mxu0  ;;  %v759_v41 = vadd.f32 %v1382_v12, %v1330_v11  ;;  %v583_v45 = vadd.s32 %v567_v48, %v551_v30  ;;  %v586_v6 = vadd.s32 %v570_v1, %v554_v58 }
 0x19b   :  { %v792_v3 = vadd.f32 %v748_v61, %v625_v19  ;;  %v626_v5 = vmul.f32 %v891_v52, %v594_v29  ;;  %v442_v59 = vpop.f32.mrb[7].mxu0  ;;  %v584_v44 = vadd.s32 %v568_v33, %v552_v39  ;;  %v601_v13 = vand.u32 4294959104, %v585_v24 }
 0x19c   :  { %v790_v43 = vadd.f32 %v740_v18, %v623_v50  ;;  %v624_v46 = vmul.f32 %v592_v49, %v442_v59  ;;  %v772_v49 = vadd.f32 %v1382_v12, %v1334_v26  ;;  %v599_v11 = vand.u32 4294959104, %v583_v45 }
 0x19d   :  { %808 = vst [vmem:[#allocation2 + $0x30] sm:$0xff] %v792_v3  ;;  %v793_v10 = vadd.f32 %v751_v23, %v626_v5  ;;  %v602_v52 = vand.u32 4294959104, %v586_v6  ;;  %v600_v42 = vand.u32 4294959104, %v584_v44  ;;  %v783_v8 = vadd.f32 %v1336_v28, %v1382_v12 }
 0x19e   :  { %806 = vst [vmem:[#allocation2 + $0x20] sm:$0xff] %v790_v43  ;;  %v791_v25 = vadd.f32 %v743_v17, %v624_v46 }
 0x19f   :  { %809 = vst [vmem:[#allocation2 + $0x38] sm:$0xff] %v793_v10 }
 0x1a0   :  { %807 = vst [vmem:[#allocation2 + $0x28] sm:$0xff] %v791_v25  ;;  %v894_v54 = vpop.f32.mrb[8].mxu0 }
 0x1a1   :  { %v629_v31 = vmul.f32 %v894_v54, %v597_v37  ;;  %v455_v32 = vpop.f32.mrb[9].mxu0 }
 0x1a2   :  { %v627_v0 = vmul.f32 %v595_v27, %v455_v32  ;;  %v895_v40 = vpop.f32.mrb[10].mxu0 }
 0x1a3   :  { %v796_v61 = vadd.f32 %v764_v34, %v629_v31  ;;  %v630_v15 = vmul.f32 %v895_v40, %v598_v47  ;;  %v458_v29 = vpop.f32.mrb[11].mxu0 }
 0x1a4   :  { %v794_v2 = vadd.f32 %v756_v16, %v627_v0  ;;  %v628_v18 = vmul.f32 %v596_v51, %v458_v29 }
 0x1a5   :  { %812 = vst [vmem:[#allocation2 + $0x50] sm:$0xff] %v796_v61  ;;  %v797_v55 = vadd.f32 %v767_v14, %v630_v15 }
 0x1a6   :  { %810 = vst [vmem:[#allocation2 + $0x40] sm:$0xff] %v794_v2  ;;  %v795_v19 = vadd.f32 %v759_v41, %v628_v18 }
 0x1a7   :  { %813 = vst [vmem:[#allocation2 + $0x58] sm:$0xff] %v797_v55 }
 0x1a8   :  { %811 = vst [vmem:[#allocation2 + $0x48] sm:$0xff] %v795_v19  ;;  %v898_v36 = vpop.f32.mrb[12].mxu0 }
 0x1a9   :  { %v633_v53 = vmul.f32 %v898_v36, %v601_v13  ;;  %v471_v50 = vpop.f32.mrb[13].mxu0 }
 0x1aa   :  { %v631_v22 = vmul.f32 %v599_v11, %v471_v50  ;;  %v899_v35 = vpop.f32.mrb[14].mxu0 }
 0x1ab   :  { %v800_v23 = vadd.f32 %v780_v63, %v633_v53  ;;  %v634_v3 = vmul.f32 %v899_v35, %v602_v52  ;;  %v474_v5 = vpop.f32.mrb[15].mxu0 }
 0x1ac   :  { %v798_v26 = vadd.f32 %v772_v49, %v631_v22  ;;  %v632_v59 = vmul.f32 %v600_v42, %v474_v5 }
 0x1ad   :  { %816 = vst [vmem:[#allocation2 + $0x70] sm:$0xff] %v800_v23  ;;  %v801_v21 = vadd.f32 %v783_v8, %v634_v3 }
 0x1ae   :  { %814 = vst [vmem:[#allocation2 + $0x60] sm:$0xff] %v798_v26  ;;  %v799_v17 = vadd.f32 %v775_v57, %v632_v59 }
 0x1af   :  { %817 = vst [vmem:[#allocation2 + $0x78] sm:$0xff] %v801_v21 }
 0x1b0   :  { %815 = vst [vmem:[#allocation2 + $0x68] sm:$0xff] %v799_v17 }
 0x1b1   :  { %970 = shalt.err (!%p967_p4)
}
 0x1b2   :  { %s971_s12 = scalar_lea.hbm %s1452_s4, 2048 }
 0x1b3   :  { %p972_p5 = scmp.ne.s32.totalorder %s1452_s4, %s971_s12  ;;  %p975_p6 = scmp.lt.u32.totalorder %s971_s12, %s1452_s4 }
 0x1b5   :  { %p977_p7 = pnand %p975_p6, %p972_p5 }
 0x1b7   :  { %980 = shalt.err (!%p977_p7)
}
 0x1b8   :  { %s984_s17 = smov 128   ;;  %s985_s18 = smov 8  }
 0x1b9   :  { %829 = dma.vmem_to_hbm [thread:$0]  %s824_s9, 2048, %s1452_s4, [#allocation3], %s984_s17, %s984_s17, %s985_s18  }
 0x1ba   :  { %981 = dma.done.wait [#allocation3], 2048  }
 0x1bb   :  { %982 = vsyncadd [#allocation3], 4294965248 }
 0x1bc   :  { %833 = vsyncpa [#allocation3], 1 }

</bundles_post_ra>
